<compile_context>
chip_gen: v7x
topology: tpu7x:2x2x1
jax: 0.10.0
libtpu: 0.0.40
codegen_flags: <defaults>
</compile_context>

<pallas_src>
import jax
import jax.numpy as jnp
from jax.experimental import pallas as pl
from jax.experimental.pallas import tpu as pltpu


def joint_entropy_tile_kernel(a_ref, b_ref, o_ref):
    """One (TM, TN) output tile, accumulated over the K ("arbitrary") grid axis.

    a_ref : (TM, TK)  tile of A' = [-x1*log x1 | x1]
    b_ref : (TN, TK)  tile of B' = [ x2 | -x2*log x2 ]
    o_ref : (TM, TN)  f32 output tile (resident across the K axis)
    """
    k = pl.program_id(2)
    partial = jax.lax.dot_general(
        a_ref[...], b_ref[...],
        dimension_numbers=(((1,), (1,)), ((), ())),   # contract last dims (A' @ B'^T)
        preferred_element_type=jnp.float32,
    )

    @pl.when(k == 0)
    def _():
        o_ref[...] = partial

    @pl.when(k != 0)
    def _():
        o_ref[...] = o_ref[...] + partial


def _round_up(x, m):
    return ((x + m - 1) // m) * m


def batch_distance(x1, x2=None, *, tile_m=512, tile_n=256, tk=4096,
                   operand_dtype=jnp.bfloat16):
    """Pallas implementation of BatchDistance.forward with op=joint_entropy.

    Inputs are (1, 1, N, F); output is the (N1, N2) pairwise joint-entropy
    matrix in float32. operand_dtype=jnp.bfloat16 is the fast (single-pass MXU)
    path; accumulation is always float32.
    """
    if x2 is None:
        x2 = x1
    assert x1.ndim == 4 and x2.ndim == 4
    assert x1.shape[0] == 1 and x1.shape[1] == 1, "leading batch dims must be 1"
    assert x2.shape[0] == 1 and x2.shape[1] == 1, "leading batch dims must be 1"
    n1, f = x1.shape[2], x1.shape[3]
    n2 = x2.shape[2]
    assert x2.shape[3] == f

    a32 = x1.reshape(n1, f).astype(jnp.float32)
    b32 = x2.reshape(n2, f).astype(jnp.float32)

    # One-time x*log(x) pass (EUP work hoisted out of the per-tile kernel) with
    # the 0*log(0)=0 convention; negation folded in here so the kernel is a
    # plain accumulate-and-store.
    a_xlogx = jnp.where(a32 > 0.0, a32 * jnp.log(a32), 0.0)
    b_xlogx = jnp.where(b32 > 0.0, b32 * jnp.log(b32), 0.0)
    a_cat = jnp.concatenate([-a_xlogx, a32], axis=1)   # (n1, 2f)
    b_cat = jnp.concatenate([b32, -b_xlogx], axis=1)   # (n2, 2f)

    # Tile sizes: clamp to (padded) input extents; keep multiples of 128 so the
    # output stays lane-dense and the MXU sees full-width tiles.
    tm = min(_round_up(tile_m, 128), _round_up(n1, 128))
    tn = min(_round_up(tile_n, 128), _round_up(n2, 128))
    k_raw = 2 * f
    tk_eff = min(_round_up(tk, 128), _round_up(k_raw, 128))
    n1p = _round_up(n1, tm)
    n2p = _round_up(n2, tn)
    kp = _round_up(k_raw, tk_eff)

    # Zero padding contributes exactly 0 to every dot product.
    a_cat = jnp.pad(a_cat, ((0, n1p - n1), (0, kp - k_raw))).astype(operand_dtype)
    b_cat = jnp.pad(b_cat, ((0, n2p - n2), (0, kp - k_raw))).astype(operand_dtype)

    gi, gj, gk = n1p // tm, n2p // tn, kp // tk_eff
    grid = (gi, gj, gk)

    itemsize = jnp.dtype(operand_dtype).itemsize
    # Double-buffered input tiles + double-buffered f32 output tile, with 2x
    # headroom, kept inside the v7x 64 MiB/TC budget.
    vmem_need = 2 * (tm + tn) * tk_eff * itemsize + 2 * tm * tn * 4
    vmem_limit = int(min(max(2 * vmem_need, 32 * 1024 * 1024), 48 * 1024 * 1024))

    cost = pl.CostEstimate(
        flops=2 * n1p * n2p * kp,                       # one matmul over K = 2*Fp
        transcendentals=0,                              # logs hoisted to the wrapper
        bytes_accessed=(n1p * kp * itemsize * (gj if gk > 1 else 1)   # A' tiles
                        + n2p * kp * itemsize * gi                    # B' tiles
                        + n1p * n2p * 4),                             # output
    )

    out = pl.pallas_call(
        joint_entropy_tile_kernel,
        out_shape=jax.ShapeDtypeStruct((n1p, n2p), jnp.float32),
        grid_spec=pltpu.PrefetchScalarGridSpec(
            num_scalar_prefetch=0,
            grid=grid,
            in_specs=[
                pl.BlockSpec((tm, tk_eff), lambda i, j, k: (i, k)),   # A' row tile
                pl.BlockSpec((tn, tk_eff), lambda i, j, k: (j, k)),   # B' row tile
            ],
            out_specs=pl.BlockSpec((tm, tn), lambda i, j, k: (i, j)),
        ),
        compiler_params=pltpu.CompilerParams(
            dimension_semantics=("parallel", "parallel", "arbitrary"),
            vmem_limit_bytes=vmem_limit,
        ),
        cost_estimate=cost,
    )(a_cat, b_cat)
    return out[:n1, :n2]


def _reference(x1, x2=None):
    """Pure-JAX reference (direct p*log(p) formula) for correctness checking."""
    if x2 is None:
        x2 = x1
    a = x1.reshape(x1.shape[2], x1.shape[3]).astype(jnp.float32)
    b = x2.reshape(x2.shape[2], x2.shape[3]).astype(jnp.float32)
    joint = a[:, None, :] * b[None, :, :]
    return -jnp.sum(joint * jnp.log(joint), axis=-1)


if __name__ == "__main__":
    key = jax.random.PRNGKey(0)
    k1, k2 = jax.random.split(key)
    N1, N2, F = 16, 24, 96
    # Positive inputs so log(joint) is finite (as the entropy op assumes).
    x1 = jax.random.uniform(k1, (1, 1, N1, F), jnp.float32, minval=0.1, maxval=1.0)
    x2 = jax.random.uniform(k2, (1, 1, N2, F), jnp.float32, minval=0.1, maxval=1.0)

    # x2=None path (x1 vs itself, symmetric matrix).
    d_self = batch_distance(x1)
    jax.block_until_ready(d_self)
    # distinct x1 / x2 path (non-square, non-tile-aligned shapes).
    d_cross = batch_distance(x1, x2)
    jax.block_until_ready(d_cross)
    # force the K-chunked (3rd grid axis, nk > 1) accumulation path.
    d_cross_kchunk = batch_distance(x1, x2, tile_m=128, tile_n=128, tk=128)
    jax.block_until_ready(d_cross_kchunk)

    ref_self = _reference(x1)
    ref_cross = _reference(x1, x2)
    assert d_self.shape == (N1, N1) and d_cross.shape == (N1, N2)
    # bf16 MXU operands (f32 accumulation): ~0.5% relative error, no cancellation.
    assert jnp.allclose(d_self, ref_self, rtol=2e-2, atol=2e-2)
    assert jnp.allclose(d_cross, ref_cross, rtol=2e-2, atol=2e-2)
    assert jnp.allclose(d_cross_kchunk, ref_cross, rtol=2e-2, atol=2e-2)
    # symmetry of the self-distance matrix (matches the triu + symmetrize path).
    assert jnp.allclose(d_self, d_self.T, rtol=1e-3, atol=1e-3)

    print("KERNEL_OK")
</pallas_src>

<mosaic_0001>
module attributes {stable_mosaic.version = 11 : i64} {
  func.func @joint_entropy_tile_kernel(%arg0: i32, %arg1: i32, %arg2: i32, %arg3: memref<128x256xbf16, #tpu.memory_space<vmem>>, %arg4: memref<128x256xbf16, #tpu.memory_space<vmem>>, %arg5: memref<128x128xf32, #tpu.memory_space<vmem>>) attributes {dimension_semantics = [#tpu.dimension_semantics<parallel>, #tpu.dimension_semantics<parallel>, #tpu.dimension_semantics<arbitrary>], iteration_bounds = array<i64: 1, 1, 1>, scalar_prefetch = 0 : i64, scratch_operands = 0 : i64, tpu.core_type = #tpu.core_type<tc>, window_params = [{transform_indices = @transform_0, window_bounds = array<i64: 128, 256>}, {transform_indices = @transform_1, window_bounds = array<i64: 128, 256>}, {transform_indices = @transform_2, window_bounds = array<i64: 128, 128>}]} {
    %c0 = arith.constant 0 : index
    %c0_0 = arith.constant 0 : index
    %0 = vector.load %arg3[%c0, %c0_0] : memref<128x256xbf16, #tpu.memory_space<vmem>>, vector<128x256xbf16>
    %c0_1 = arith.constant 0 : index
    %c0_2 = arith.constant 0 : index
    %1 = vector.load %arg4[%c0_1, %c0_2] : memref<128x256xbf16, #tpu.memory_space<vmem>>, vector<128x256xbf16>
    %cst = arith.constant dense<0.000000e+00> : vector<128x128xf32>
    %2 = tpu.matmul %0, %1, %cst {dimension_numbers = #tpu.dot_dimension_numbers<[1], [1], [0], [0], [0, 0, 1, 0], [], []>} : vector<128x256xbf16>, vector<128x256xbf16>, vector<128x128xf32> -> vector<128x128xf32>
    %c0_i32 = arith.constant 0 : i32
    %3 = arith.cmpi eq, %arg2, %c0_i32 : i32
    %4 = arith.extui %3 : i1 to i32
    %c0_i32_3 = arith.constant 0 : i32
    %5 = arith.cmpi ne, %4, %c0_i32_3 : i32
    scf.if %5 {
      %c0_6 = arith.constant 0 : index
      %c0_7 = arith.constant 0 : index
      %9 = vector.load %arg5[%c0_6, %c0_7] : memref<128x128xf32, #tpu.memory_space<vmem>>, vector<128x128xf32>
      tpu.vector_store %arg5[%c0_6, %c0_7], %2 {strides = array<i32>} : memref<128x128xf32, #tpu.memory_space<vmem>>, vector<128x128xf32>,
    } else {
    }
    %c0_i32_4 = arith.constant 0 : i32
    %6 = arith.cmpi ne, %arg2, %c0_i32_4 : i32
    %7 = arith.extui %6 : i1 to i32
    %c0_i32_5 = arith.constant 0 : i32
    %8 = arith.cmpi ne, %7, %c0_i32_5 : i32
    scf.if %8 {
      %c0_6 = arith.constant 0 : index
      %c0_7 = arith.constant 0 : index
      %9 = vector.load %arg5[%c0_6, %c0_7] : memref<128x128xf32, #tpu.memory_space<vmem>>, vector<128x128xf32>
      %10 = arith.addf %9, %2 : vector<128x128xf32>
      %c0_8 = arith.constant 0 : index
      %c0_9 = arith.constant 0 : index
      %11 = vector.load %arg5[%c0_8, %c0_9] : memref<128x128xf32, #tpu.memory_space<vmem>>, vector<128x128xf32>
      tpu.vector_store %arg5[%c0_8, %c0_9], %10 {strides = array<i32>} : memref<128x128xf32, #tpu.memory_space<vmem>>, vector<128x128xf32>,
    } else {
    }
    return
  }
  func.func @transform_0(%arg0: i32, %arg1: i32, %arg2: i32) -> (i32, i32) {
    %c0_i32 = arith.constant 0 : i32
    return %arg0, %arg2 : i32, i32
  }
  func.func @transform_1(%arg0: i32, %arg1: i32, %arg2: i32) -> (i32, i32) {
    %c0_i32 = arith.constant 0 : i32
    return %arg1, %arg2 : i32, i32
  }
  func.func @transform_2(%arg0: i32, %arg1: i32, %arg2: i32) -> (i32, i32) {
    %c0_i32 = arith.constant 0 : i32
    return %arg0, %arg1 : i32, i32
  }
}

</mosaic_0001>

<bundles_post_ra>
// kernel: tpu_custom_call.1
= control target key start
LH: loop header
LB: loop body
LE: loop exit
PB: predicated region body
PF: predicated region fallthrough
CT: control target
= control target key end

     0   :  { %7 = vsyncpa [#allocation3], 0  ;;  %s658_s0 = inlined_call_operand.hbm [shape: bf16[128,256], index: 0, kind: input, shape index: {}]   ;;  %s659_s1 = inlined_call_operand.hbm [shape: bf16[128,256], index: 1, kind: input, shape index: {}]   ;;  %s660_s2 = inlined_call_operand.hbm [shape: f32[128,128], index: 2, kind: output, shape index: {}]  }
   0x1   :  { %8 = vsyncpa [#allocation6], 0 }
   0x2   :  { %9 = vsyncpa [#allocation4], 0  ;;  %s593_s9 = smov [#allocation2]   ;;  %s521_s13 = scalar_lea.hbm %s658_s0, 2048 }
   0x3   :  { %s15_s10 = sshll.u32 %s593_s9, 4  ;;  %p522_p0 = scmp.ne.s32.totalorder %s658_s0, %s521_s13  ;;  %s16_s10 = int_to_ptr.vmem [resolvable:$true] %s15_s10 }
   0x4   :  { %p525_p1 = scmp.lt.u32.totalorder %s521_s13, %s658_s0 }
   0x6   :  { %p527_p2 = pnand %p525_p1, %p522_p0 }
   0x8   :  { %530 = shalt.err (!%p527_p2)
}
   0x9   :  { %s531_s18 = scalar_lea.vmem %s16_s10, 2048  ;;  %p536_p4 = scmp.lt.s32.totalorder %s16_s10, %s16_s10 }
   0xa   :  { %p532_p3 = scmp.ne.s32.totalorder %s16_s10, %s531_s18  ;;  %p537_p5 = scmp.lt.s32.totalorder %s531_s18, %s531_s18 }
   0xc   :  { %p538_p6 = por %p537_p5, %p536_p4 }
   0xe   :  { %p539_p7 = pnand %p538_p6, %p532_p3 }
  0x10   :  { %542 = shalt.err (!%p539_p7)
}
  0x11   :  { %s594_s19 = smov 128   ;;  %s595_s20 = smov 8  }
  0x12   :  { %21 = dma.hbm_to_vmem [thread:$0]  %s658_s0, 2048, %s16_s10, [#allocation3], %s594_s19, %s594_s19, %s595_s20  }
  0x13   :  { %s596_s23 = smov [#allocation5]   ;;  %s543_s27 = scalar_lea.hbm %s659_s1, 2048 }
  0x14   :  { %s27_s24 = sshll.u32 %s596_s23, 4  ;;  %p544_p8 = scmp.ne.s32.totalorder %s659_s1, %s543_s27  ;;  %s28_s24 = int_to_ptr.vmem [resolvable:$true] %s27_s24 }
  0x15   :  { %p547_p9 = scmp.lt.u32.totalorder %s543_s27, %s659_s1 }
  0x17   :  { %p549_p10 = pnand %p547_p9, %p544_p8 }
  0x19   :  { %552 = shalt.err (!%p549_p10)
}
  0x1a   :  { %s553_s4 = scalar_lea.vmem %s28_s24, 2048  ;;  %p558_p12 = scmp.lt.s32.totalorder %s28_s24, %s28_s24 }
  0x1b   :  { %p554_p11 = scmp.ne.s32.totalorder %s28_s24, %s553_s4  ;;  %p559_p13 = scmp.lt.s32.totalorder %s553_s4, %s553_s4 }
  0x1d   :  { %p560_p0 = por %p559_p13, %p558_p12 }
  0x1f   :  { %p561_p1 = pnand %p560_p0, %p554_p11 }
  0x21   :  { %564 = shalt.err (!%p561_p1)
}
  0x22   :  { %33 = dma.hbm_to_vmem [thread:$0]  %s659_s1, 2048, %s28_s24, [#allocation6], %s594_s19, %s594_s19, %s595_s20  }
  0x23   :  { %587 = dma.done.wait [#allocation3], 2048  }
  0x24   :  { %588 = vsyncadd [#allocation3], 4294965248 }
  0x25   :  { %589 = dma.done.wait [#allocation6], 2048  }
  0x26   :  { %590 = vsyncadd [#allocation6], 4294965248  ;;  %v473_v0 = vld [vmem:[#allocation5 + $0x4] ss:$8 sps:$4 sm:$0xff]   ;;  %v475_v1 = vld [vmem:[#allocation5] ss:$8 sps:$4 sm:$0xff]  }
  0x27   :  { %233 = vmatprep.subr.bf16.mxu0 %v473_v0  ;;  %452 = vmatprep.subr.bf16.mxu1 %v473_v0  ;;  %v476_v2 = vld [vmem:[#allocation5 + $0x14] ss:$8 sps:$4 sm:$0xff]   ;;  %v478_v3 = vld [vmem:[#allocation5 + $0x10] ss:$8 sps:$4 sm:$0xff]   ;;  %v479_v4 = vld [vmem:[#allocation5 + $0x24] ss:$8 sps:$4 sm:$0xff]  }
  0x28   :  { %234 = vmatpush1.bf16.xpose.msra.mxu0 %v475_v1  ;;  %460 = vmatpush1.bf16.xpose.msra.mxu1 %v475_v1  ;;  %v499_v5 = vld [vmem:[#allocation2 + $0x4] ss:$8 sps:$4 sm:$0xff]   ;;  %v481_v7 = vld [vmem:[#allocation5 + $0x20] ss:$8 sps:$4 sm:$0xff]   ;;  %v482_v8 = vld [vmem:[#allocation5 + $0x34] ss:$8 sps:$4 sm:$0xff]  }
  0x29   :  { %235 = vmatprep.subr.bf16.mxu0 %v476_v2  ;;  %453 = vmatprep.subr.bf16.mxu1 %v476_v2  ;;  %v502_v6 = vld [vmem:[#allocation2 + $0x44] ss:$8 sps:$4 sm:$0xff]   ;;  %v484_v9 = vld [vmem:[#allocation5 + $0x30] ss:$8 sps:$4 sm:$0xff]   ;;  %v487_v11 = vld [vmem:[#allocation5 + $0x40] ss:$8 sps:$4 sm:$0xff]  }
  0x2a   :  { %265 = vmatprep.mubr.bf16.mxu0 %v499_v5  ;;  %297 = vmatprep.mubr.bf16.mxu1 %v502_v6  ;;  %v485_v10 = vld [vmem:[#allocation5 + $0x44] ss:$8 sps:$4 sm:$0xff]   ;;  %v488_v12 = vld [vmem:[#allocation5 + $0x54] ss:$8 sps:$4 sm:$0xff]   ;;  %v490_v13 = vld [vmem:[#allocation5 + $0x50] ss:$8 sps:$4 sm:$0xff]  }
  0x2b   :  { %v491_v14 = vld [vmem:[#allocation5 + $0x64] ss:$8 sps:$4 sm:$0xff]   ;;  %v493_v15 = vld [vmem:[#allocation5 + $0x60] ss:$8 sps:$4 sm:$0xff]   ;;  %v494_v16 = vld [vmem:[#allocation5 + $0x74] ss:$8 sps:$4 sm:$0xff]  }
  0x2c   :  { %v496_v17 = vld [vmem:[#allocation5 + $0x70] ss:$8 sps:$4 sm:$0xff]   ;;  %v497_v18 = vld [vmem:[#allocation2] ss:$8 sps:$4 sm:$0xff]   ;;  %v503_v20 = vld [vmem:[#allocation2 + $0x14] ss:$8 sps:$4 sm:$0xff]  }
  0x2d   :  { %v500_v19 = vld [vmem:[#allocation2 + $0x40] ss:$8 sps:$4 sm:$0xff]   ;;  %v505_v21 = vld [vmem:[#allocation2 + $0x54] ss:$8 sps:$4 sm:$0xff]   ;;  %v507_v22 = vld [vmem:[#allocation2 + $0x10] ss:$8 sps:$4 sm:$0xff]  }
  0x2e   :  { %v508_v23 = vld [vmem:[#allocation2 + $0x50] ss:$8 sps:$4 sm:$0xff]   ;;  %v509_v24 = vld [vmem:[#allocation2 + $0x24] ss:$8 sps:$4 sm:$0xff]   ;;  %v513_v26 = vld [vmem:[#allocation2 + $0x20] ss:$8 sps:$4 sm:$0xff]  }
  0x2f   :  { %v511_v25 = vld [vmem:[#allocation2 + $0x64] ss:$8 sps:$4 sm:$0xff]   ;;  %v514_v27 = vld [vmem:[#allocation2 + $0x60] ss:$8 sps:$4 sm:$0xff]   ;;  %v515_v28 = vld [vmem:[#allocation2 + $0x34] ss:$8 sps:$4 sm:$0xff]  }
  0x30   :  { %236 = vmatpush1.bf16.xpose.msra.mxu0 %v478_v3  ;;  %461 = vmatpush1.bf16.xpose.msra.mxu1 %v478_v3  ;;  %v517_v29 = vld [vmem:[#allocation2 + $0x74] ss:$8 sps:$4 sm:$0xff]   ;;  %v519_v30 = vld [vmem:[#allocation2 + $0x30] ss:$8 sps:$4 sm:$0xff]   ;;  %s597_s1 = smov [#allocation7]  }
  0x31   :  { %237 = vmatprep.subr.bf16.mxu0 %v479_v4  ;;  %454 = vmatprep.subr.bf16.mxu1 %v479_v4  ;;  %v520_v31 = vld [vmem:[#allocation2 + $0x70] ss:$8 sps:$4 sm:$0xff]   ;;  %s407_s6 = sshll.u32 %s597_s1, 4  ;;  %s408_s6 = int_to_ptr.vmem [resolvable:$true] %s407_s6 }
  0x32   :  { %s565_s7 = scalar_lea.vmem %s408_s6, 2048  ;;  %p570_p3 = scmp.lt.s32.totalorder %s408_s6, %s408_s6 }
  0x33   :  { %p566_p2 = scmp.ne.s32.totalorder %s408_s6, %s565_s7  ;;  %p571_p4 = scmp.lt.s32.totalorder %s565_s7, %s565_s7 }
  0x35   :  { %p572_p5 = por %p571_p4, %p570_p3 }
  0x37   :  { %p573_p6 = pnand %p572_p5, %p566_p2 }
  0x38   :  { %238 = vmatpush1.bf16.xpose.msra.mxu0 %v481_v7  ;;  %462 = vmatpush1.bf16.xpose.msra.mxu1 %v481_v7 }
  0x39   :  { %239 = vmatprep.subr.bf16.mxu0 %v482_v8  ;;  %455 = vmatprep.subr.bf16.mxu1 %v482_v8 }
  0x40   :  { %240 = vmatpush1.bf16.xpose.msra.mxu0 %v484_v9  ;;  %463 = vmatpush1.bf16.xpose.msra.mxu1 %v484_v9 }
  0x41   :  { %241 = vmatprep.subr.bf16.mxu0 %v485_v10  ;;  %456 = vmatprep.subr.bf16.mxu1 %v485_v10 }
  0x48   :  { %242 = vmatpush1.bf16.xpose.msra.mxu0 %v487_v11  ;;  %464 = vmatpush1.bf16.xpose.msra.mxu1 %v487_v11 }
  0x49   :  { %243 = vmatprep.subr.bf16.mxu0 %v488_v12  ;;  %457 = vmatprep.subr.bf16.mxu1 %v488_v12 }
  0x50   :  { %244 = vmatpush1.bf16.xpose.msra.mxu0 %v490_v13  ;;  %465 = vmatpush1.bf16.xpose.msra.mxu1 %v490_v13 }
  0x51   :  { %245 = vmatprep.subr.bf16.mxu0 %v491_v14  ;;  %458 = vmatprep.subr.bf16.mxu1 %v491_v14 }
  0x58   :  { %246 = vmatpush1.bf16.xpose.msra.mxu0 %v493_v15  ;;  %466 = vmatpush1.bf16.xpose.msra.mxu1 %v493_v15 }
  0x59   :  { %247 = vmatprep.subr.bf16.mxu0 %v494_v16  ;;  %459 = vmatprep.subr.bf16.mxu1 %v494_v16 }
  0x60   :  { %248 = vmatpush1.bf16.xpose.msra.mxu0 %v496_v17  ;;  %467 = vmatpush1.bf16.xpose.msra.mxu1 %v496_v17 }
  0x67   :  { %266 = vmatmul.mubr.bf16.vlgmr.msra.gmra.mrb[0].mxu0 %v497_v18  ;;  %298 = vmatmul.mubr.bf16.vlgmr.msra.gmra.mrb[0].mxu1 %v500_v19 }
  0x68   :  { %273 = vmatprep.mubr.bf16.mxu0 %v503_v20  ;;  %305 = vmatprep.mubr.bf16.mxu1 %v505_v21 }
  0x6f   :  { %274 = vmatmul.mubr.bf16.gmra.mrb[4].mxu0 %v507_v22  ;;  %306 = vmatmul.mubr.bf16.gmra.mrb[4].mxu1 %v508_v23 }
  0x70   :  { %281 = vmatprep.mubr.bf16.mxu0 %v509_v24  ;;  %313 = vmatprep.mubr.bf16.mxu1 %v511_v25 }
  0x77   :  { %282 = vmatmul.mubr.bf16.gmra.mrb[8].mxu0 %v513_v26  ;;  %314 = vmatmul.mubr.bf16.gmra.mrb[8].mxu1 %v514_v27 }
  0x78   :  { %289 = vmatprep.mubr.bf16.mxu0 %v515_v28  ;;  %321 = vmatprep.mubr.bf16.mxu1 %v517_v29 }
  0x7f   :  { %290 = vmatmul.mubr.bf16.gmra.mrb[12].mxu0 %v519_v30  ;;  %322 = vmatmul.mubr.bf16.gmra.mrb[12].mxu1 %v520_v31 }
 0x13a   :  { %v267_v32 = vpop.f32.mrb[0].mxu0  ;;  %v299_v33 = vpop.f32.mrb[0].mxu1 }
 0x13b   :  { %334 = vst [vmem:[#allocation7] sm:$0xff] %v267_v32  ;;  %342 = vst [vmem:[#allocation7 + $0x40] sm:$0xff] %v299_v33  ;;  %v269_v34 = vpop.f32.mrb[1].mxu0  ;;  %v301_v35 = vpop.f32.mrb[1].mxu1 }
 0x13c   :  { %v270_v36 = vpop.f32.mrb[2].mxu0  ;;  %v302_v37 = vpop.f32.mrb[2].mxu1 }
 0x13d   :  { %335 = vst [vmem:[#allocation7 + $0x8] sm:$0xff] %v270_v36  ;;  %343 = vst [vmem:[#allocation7 + $0x48] sm:$0xff] %v302_v37  ;;  %v272_v38 = vpop.f32.mrb[3].mxu0  ;;  %v304_v39 = vpop.f32.mrb[3].mxu1 }
 0x142   :  { %v275_v40 = vpop.f32.mrb[4].mxu0  ;;  %v307_v41 = vpop.f32.mrb[4].mxu1 }
 0x143   :  { %336 = vst [vmem:[#allocation7 + $0x10] sm:$0xff] %v275_v40  ;;  %344 = vst [vmem:[#allocation7 + $0x50] sm:$0xff] %v307_v41  ;;  %v277_v42 = vpop.f32.mrb[5].mxu0  ;;  %v309_v43 = vpop.f32.mrb[5].mxu1 }
 0x144   :  { %v278_v44 = vpop.f32.mrb[6].mxu0  ;;  %v310_v45 = vpop.f32.mrb[6].mxu1 }
 0x145   :  { %337 = vst [vmem:[#allocation7 + $0x18] sm:$0xff] %v278_v44  ;;  %345 = vst [vmem:[#allocation7 + $0x58] sm:$0xff] %v310_v45  ;;  %v280_v46 = vpop.f32.mrb[7].mxu0  ;;  %v312_v47 = vpop.f32.mrb[7].mxu1 }
 0x14a   :  { %v283_v48 = vpop.f32.mrb[8].mxu0  ;;  %v315_v49 = vpop.f32.mrb[8].mxu1 }
 0x14b   :  { %338 = vst [vmem:[#allocation7 + $0x20] sm:$0xff] %v283_v48  ;;  %346 = vst [vmem:[#allocation7 + $0x60] sm:$0xff] %v315_v49  ;;  %v285_v50 = vpop.f32.mrb[9].mxu0  ;;  %v317_v51 = vpop.f32.mrb[9].mxu1 }
 0x14c   :  { %v286_v52 = vpop.f32.mrb[10].mxu0  ;;  %v318_v53 = vpop.f32.mrb[10].mxu1 }
 0x14d   :  { %339 = vst [vmem:[#allocation7 + $0x28] sm:$0xff] %v286_v52  ;;  %347 = vst [vmem:[#allocation7 + $0x68] sm:$0xff] %v318_v53  ;;  %v288_v54 = vpop.f32.mrb[11].mxu0  ;;  %v320_v55 = vpop.f32.mrb[11].mxu1 }
 0x152   :  { %v291_v56 = vpop.f32.mrb[12].mxu0  ;;  %v323_v57 = vpop.f32.mrb[12].mxu1 }
 0x153   :  { %340 = vst [vmem:[#allocation7 + $0x30] sm:$0xff] %v291_v56  ;;  %348 = vst [vmem:[#allocation7 + $0x70] sm:$0xff] %v323_v57  ;;  %v293_v58 = vpop.f32.mrb[13].mxu0  ;;  %v325_v59 = vpop.f32.mrb[13].mxu1 }
 0x154   :  { %v294_v60 = vpop.f32.mrb[14].mxu0  ;;  %v326_v61 = vpop.f32.mrb[14].mxu1 }
 0x155   :  { %341 = vst [vmem:[#allocation7 + $0x38] sm:$0xff] %v294_v60  ;;  %349 = vst [vmem:[#allocation7 + $0x78] sm:$0xff] %v326_v61  ;;  %v296_v62 = vpop.f32.mrb[15].mxu0  ;;  %v328_v63 = vpop.f32.mrb[15].mxu1 }
 0x156   :  { %576 = shalt.err (!%p573_p6)
}
 0x157   :  { %s577_s10 = scalar_lea.hbm %s660_s2, 2048 }
 0x158   :  { %p578_p7 = scmp.ne.s32.totalorder %s660_s2, %s577_s10  ;;  %p581_p8 = scmp.lt.u32.totalorder %s577_s10, %s660_s2 }
 0x15a   :  { %p583_p9 = pnand %p581_p8, %p578_p7 }
 0x15c   :  { %586 = shalt.err (!%p583_p9)
}
 0x15d   :  { %413 = dma.vmem_to_hbm [thread:$0]  %s408_s6, 2048, %s660_s2, [#allocation4], %s594_s19, %s594_s19, %s595_s20  }
 0x15e   :  { %591 = dma.done.wait [#allocation4], 2048  }
 0x15f   :  { %592 = vsyncadd [#allocation4], 4294965248 }
 0x160   :  { %417 = vsyncpa [#allocation3], 1 }
 0x161   :  { %418 = vsyncpa [#allocation6], 1 }
 0x162   :  { %419 = vsyncpa [#allocation4], 1 }

</bundles_post_ra>
